<compile_context>
chip_gen: v6e
topology: v6e:2x2x1
jax: 0.10.0
libtpu: 0.0.40
codegen_flags: <defaults>
</compile_context>

<pallas_src>
import functools

import jax
import jax.numpy as jnp
import numpy as np
from jax import lax
from jax.experimental import pallas as pl
from jax.experimental.pallas import tpu as pltpu

SAMPLE_RATE = 16   # synthetic small sample rate so the IR stays tiny (real audio: 16000+)
LANE = 128         # time tile width on lanes


def init_ir(key, duration, in_ch, out_ch, sample_rate):
    """Deterministic re-implementation of ConvolutionalReverb.init_ir."""
    length = duration * sample_rate - 1
    ir = jax.random.normal(key, (out_ch, in_ch, length), dtype=jnp.float32)
    envelop = jnp.exp(-4.0 * jnp.linspace(0.0, float(duration), length, dtype=jnp.float32))
    ir = ir * envelop
    ir = ir / jnp.sqrt(jnp.sum(ir * ir, axis=-1, keepdims=True))
    ir = jnp.flip(ir, axis=-1)
    return ir  # (out_ch, in_ch, K)


def build_toeplitz_ir(ir, L, num_m):
    """Repack the IR as banded-Toeplitz matmul weights (one-time, wrapper-side).

    W[m, ci*L + l, co*L + t] = ir[co, ci, m*L + l - t]  if 0 <= m*L + l - t < K else 0
    so that   out[b, co, j*L + t] = sum_m  x_tile[b, j+m, :] @ W[m]   (contraction over ci, l).
    Blocks with m beyond the IR support come out all-zero (safe padding).
    """
    Cout, Cin, K = ir.shape
    l = jnp.arange(L)[:, None]                       # (L, 1)
    t = jnp.arange(L)[None, :]                       # (1, L)
    m = jnp.arange(num_m)[:, None, None]             # (num_m, 1, 1)
    k = m * L + l - t                                # (num_m, L, L)
    valid = (k >= 0) & (k < K)
    kc = jnp.clip(k, 0, K - 1).reshape(-1)
    w = jnp.take(ir, kc, axis=-1).reshape(Cout, Cin, num_m, L, L)
    w = jnp.where(valid[None, None], w, 0.0)
    # -> (num_m, Cin, l, Cout, t) -> (num_m, Cin*L, Cout*L)   (lane-dense RHS tiles)
    w = jnp.transpose(w, (2, 1, 3, 0, 4)).reshape(num_m, Cin * L, Cout * L)
    return w


def _reverb_kernel(x_ref, w_ref, o_ref, *, TJ, m_chunk, zero_tiles):
    # x_ref : (num_tiles, Cin*L)       this batch's padded, lane-tiled signal (VMEM resident)
    # w_ref : (m_chunk, Cin*L, Cout*L) Toeplitz IR blocks of tap chunk mc (resident if one chunk)
    # o_ref : (TJ, Cout*L) f32         output time-tile block jb (resident across the mc axis)
    jb = pl.program_id(1)
    mc = pl.program_id(2)

    @pl.when(mc == 0)
    def _():
        o_ref[...] = jnp.zeros_like(o_ref)

    base = jb * TJ           # first output time tile of this block
    m0 = mc * m_chunk        # first global tap block of this chunk

    def body(li, carry):
        m = m0 + li
        # Tap blocks whose x window [base+m, base+m+TJ) is entirely inside the K-sample
        # zero left-pad contribute nothing -> skip the matmul.
        @pl.when(base + m + TJ > zero_tiles)
        def _():
            xs = x_ref[pl.ds(base + m, TJ), :]                 # (TJ, Cin*L) LHS rows
            o_ref[...] += jnp.dot(xs, w_ref[li],
                                  preferred_element_type=jnp.float32)
        return carry

    lax.fori_loop(0, m_chunk, body, 0)


def _vmem_budget_bytes():
    """~75% of the chip's VMEM (64 MiB on v7x, 128 MiB on v5e/v6e); conservative fallback."""
    cap = 64 * 1024 * 1024
    try:
        info = pltpu.get_tpu_info()
        cap = int(getattr(info, "vmem_capacity_bytes", cap))
    except Exception:
        pass
    return (3 * cap) // 4


def conv_reverb_forward(x, ir, *, use_bf16=False, tj_target=256):
    """x: (B, in_ch, T) float32, ir: (out_ch, in_ch, K) float32 -> (B, out_ch, T+1)."""
    B, Cin, T = x.shape
    Cout, _, K = ir.shape
    L = LANE

    pad = K                                    # == concat([ir, ones], -1).shape[-1] - 1
    T_out = T + 1
    num_j = pl.cdiv(T_out, L)                  # output time tiles
    num_m = (K + L - 2) // L + 1               # tap blocks (reduction)

    # ---- time-tile (MXU M dim) batching: TJ output tiles per grid step ----
    TJ = num_j if num_j <= tj_target else tj_target     # tj_target is a multiple of 8
    num_jb = pl.cdiv(num_j, TJ)
    num_j_pad = num_jb * TJ

    in_dtype = jnp.bfloat16 if use_bf16 else jnp.float32
    isz = jnp.dtype(in_dtype).itemsize

    # ---- VMEM budget: keep W fully resident if it fits, otherwise stream it in chunks ----
    budget = _vmem_budget_bytes()
    x_slab = (num_j_pad + num_m) * Cin * L * isz         # per-batch signal slab (approx)
    out_blk = TJ * Cout * L * 4
    fixed = 2 * x_slab + 2 * out_blk + (1 << 20)         # double buffers + 1 MiB slack
    w_block_bytes = Cin * L * Cout * L * isz
    w_budget = max(budget - fixed, 2 * w_block_bytes)
    if 2 * num_m * w_block_bytes <= w_budget:
        m_chunk = num_m                                   # resident W (single chunk)
    else:
        m_chunk = min(num_m, max(1, w_budget // (3 * w_block_bytes)))   # streamed chunks
    num_mc = pl.cdiv(num_m, m_chunk)
    num_m_pad = num_mc * m_chunk

    num_tiles = num_j_pad + num_m_pad - 1
    T_lanes = num_tiles * L

    # Left-pad by K (reference pads by len(concat([ir, ones])) - 1 == K), right-pad to the
    # lane-tiled length.  TODO(synk): jnp.pad materializes one extra HBM copy of x; fold the
    # pad into the tiling for very long signals.
    x_pad = jnp.pad(x, ((0, 0), (0, 0), (pad, T_lanes - (T + pad))))
    # (B, Cin, num_tiles, L) -> (B, num_tiles, Cin*L): Cin merged into the contraction lanes
    # once in the wrapper (never inside the kernel).
    xt = x_pad.reshape(B, Cin, num_tiles, L)
    xt = jnp.transpose(xt, (0, 2, 1, 3)).reshape(B, num_tiles, Cin * L)

    w = build_toeplitz_ir(ir, L, num_m_pad)               # (num_m_pad, Cin*L, Cout*L)

    xt = xt.astype(in_dtype)
    w = w.astype(in_dtype)

    zero_tiles = K // L                                   # fully-zero leading x tiles

    kernel = functools.partial(_reverb_kernel, TJ=TJ, m_chunk=m_chunk, zero_tiles=zero_tiles)

    w_spec_kwargs = {}
    if num_mc > 1:
        # W stays streamed (e.g. large Cin*Cout on v7x): hide its DMA with a deeper pipeline.
        w_spec_kwargs["pipeline_mode"] = pl.Buffered(3)

    out = pl.pallas_call(
        kernel,
        out_shape=jax.ShapeDtypeStruct((B, num_j_pad, Cout * L), jnp.float32),
        grid=(B, num_jb, num_mc),
        in_specs=[
            # per-batch signal slab, DMA'd once per batch element and kept resident
            pl.BlockSpec((None, num_tiles, Cin * L), lambda b, jb, mc: (b, 0, 0)),
            # Toeplitz IR: resident (num_mc == 1) or streamed per tap chunk
            pl.BlockSpec((m_chunk, Cin * L, Cout * L), lambda b, jb, mc: (mc, 0, 0),
                         **w_spec_kwargs),
        ],
        # lane-dense f32 output block, constant across the mc reduction axis (accumulator)
        out_specs=pl.BlockSpec((None, TJ, Cout * L), lambda b, jb, mc: (b, jb, 0)),
        compiler_params=pltpu.CompilerParams(
            dimension_semantics=("parallel", "parallel", "arbitrary"),
            vmem_limit_bytes=budget,
        ),
    )(xt, w)

    # (B, num_j_pad, Cout*L) -> (B, Cout, num_j_pad*L) -> trim 128-lane padding
    out = out.reshape(B, num_j_pad, Cout, L)
    out = jnp.transpose(out, (0, 2, 1, 3)).reshape(B, Cout, num_j_pad * L)
    return out[:, :, :T_out]


def _reference_np(x, ir):
    """Pure-numpy f64 reference: cross-correlation (F.conv1d semantics) on the K-left-padded x."""
    x = np.asarray(x, np.float64)
    ir = np.asarray(ir, np.float64)
    B, Cin, T = x.shape
    Cout, _, K = ir.shape
    xp = np.pad(x, ((0, 0), (0, 0), (K, 0)))
    out = np.zeros((B, Cout, T + 1), np.float64)
    for b in range(B):
        for co in range(Cout):
            for t in range(T + 1):
                out[b, co, t] = np.sum(xp[b, :, t:t + K] * ir[co])
    return out.astype(np.float32)


if __name__ == "__main__":
    duration, in_ch, out_ch = 3, 1, 1
    B, T = 2, 16

    key = jax.random.PRNGKey(0)
    k_ir, k_x = jax.random.split(key)

    ir = init_ir(k_ir, duration, in_ch, out_ch, SAMPLE_RATE)     # (1, 1, 47)
    x = jax.random.normal(k_x, (B, in_ch, T), dtype=jnp.float32)

    ref = _reference_np(x, ir)

    # f32 path (tight check against the f64 reference)
    out = jax.block_until_ready(conv_reverb_forward(x, ir, use_bf16=False))
    assert out.shape == (B, out_ch, T + 1), out.shape
    np.testing.assert_allclose(np.asarray(out), ref, rtol=5e-3, atol=5e-3)

    # bf16 production path (native MXU dtype on v5e/v6e/v7x, f32 accumulation), looser tolerance
    out_bf16 = jax.block_until_ready(conv_reverb_forward(x, ir, use_bf16=True))
    np.testing.assert_allclose(np.asarray(out_bf16), ref, rtol=3e-2, atol=3e-2)

    print("KERNEL_OK")
</pallas_src>

<mosaic_0001>
module attributes {stable_mosaic.version = 11 : i64} {
  func.func @_reverb_kernel(%arg0: i32, %arg1: i32, %arg2: i32, %arg3: memref<1x2x128xf32, #tpu.memory_space<vmem>>, %arg4: memref<2x128x128xf32, #tpu.memory_space<vmem>>, %arg5: memref<1x1x128xf32, #tpu.memory_space<vmem>>) attributes {dimension_semantics = [#tpu.dimension_semantics<parallel>, #tpu.dimension_semantics<parallel>, #tpu.dimension_semantics<arbitrary>], iteration_bounds = array<i64: 2, 1, 1>, scalar_prefetch = 0 : i64, scratch_operands = 0 : i64, tpu.core_type = #tpu.core_type<tc>, window_params = [{transform_indices = @transform_0, window_bounds = array<i64: 1, 2, 128>}, {transform_indices = @transform_1, window_bounds = array<i64: 2, 128, 128>}, {transform_indices = @transform_2, window_bounds = array<i64: 1, 1, 128>}]} {
    %c0_i32 = arith.constant 0 : i32
    %0 = arith.cmpi eq, %arg2, %c0_i32 : i32
    %1 = arith.extui %0 : i1 to i32
    %c0_i32_0 = arith.constant 0 : i32
    %2 = arith.cmpi ne, %1, %c0_i32_0 : i32
    scf.if %2 {
      %cst = arith.constant 0.000000e+00 : f32
      %6 = vector.broadcast %cst : f32 to vector<1x128xf32>
      %c0 = arith.constant 0 : index
      %c0_5 = arith.constant 0 : index
      %c0_6 = arith.constant 0 : index
      %7 = vector.load %arg5[%c0, %c0_5, %c0_6] : memref<1x1x128xf32, #tpu.memory_space<vmem>>, vector<1x1x128xf32>
      %8 = vector.shape_cast %7 : vector<1x1x128xf32> to vector<1x128xf32>
      %9 = vector.shape_cast %6 : vector<1x128xf32> to vector<1x1x128xf32>
      tpu.vector_store %arg5[%c0, %c0_5, %c0_6], %9 {strides = array<i32>} : memref<1x1x128xf32, #tpu.memory_space<vmem>>, vector<1x1x128xf32>,
    } else {
    }
    %c1_i32 = arith.constant 1 : i32
    %3 = arith.muli %arg1, %c1_i32 : i32
    %c2_i32 = arith.constant 2 : i32
    %4 = arith.muli %arg2, %c2_i32 : i32
    %c0_i32_1 = arith.constant 0 : i32
    %c2_i32_2 = arith.constant 2 : i32
    %5 = arith.addi %c0_i32_1, %c2_i32_2 : i32
    %c1_i32_3 = arith.constant 1 : i32
    scf.for %arg6 = %c0_i32_1 to %5 step %c1_i32_3  : i32 {
      %6 = arith.addi %4, %arg6 : i32
      %7 = arith.addi %3, %6 : i32
      %c1_i32_5 = arith.constant 1 : i32
      %8 = arith.addi %7, %c1_i32_5 : i32
      %c0_i32_6 = arith.constant 0 : i32
      %9 = arith.cmpi sgt, %8, %c0_i32_6 : i32
      %10 = arith.extui %9 : i1 to i32
      %c0_i32_7 = arith.constant 0 : i32
      %11 = arith.cmpi ne, %10, %c0_i32_7 : i32
      scf.if %11 {
        %12 = arith.addi %3, %6 : i32
        %c0 = arith.constant 0 : index
        %13 = arith.index_cast %12 : i32 to index
        %c0_8 = arith.constant 0 : index
        %14 = vector.load %arg3[%c0, %13, %c0_8] : memref<1x2x128xf32, #tpu.memory_space<vmem>>, vector<1x1x128xf32>
        %15 = vector.shape_cast %14 : vector<1x1x128xf32> to vector<1x128xf32>
        %c0_9 = arith.constant 0 : index
        %c0_10 = arith.constant 0 : index
        %c0_11 = arith.constant 0 : index
        %16 = vector.load %arg5[%c0_9, %c0_10, %c0_11] : memref<1x1x128xf32, #tpu.memory_space<vmem>>, vector<1x1x128xf32>
        %17 = vector.shape_cast %16 : vector<1x1x128xf32> to vector<1x128xf32>
        %18 = arith.index_cast %arg6 : i32 to index
        %c0_12 = arith.constant 0 : index
        %c0_13 = arith.constant 0 : index
        %19 = vector.load %arg4[%18, %c0_12, %c0_13] : memref<2x128x128xf32, #tpu.memory_space<vmem>>, vector<1x128x128xf32>
        %20 = vector.shape_cast %19 : vector<1x128x128xf32> to vector<128x128xf32>
        %cst = arith.constant dense<0.000000e+00> : vector<1x128xf32>
        %21 = tpu.matmul %15, %20, %cst {dimension_numbers = #tpu.dot_dimension_numbers<[1], [0], [0], [1], [0, 0, 1, 1], [], []>} : vector<1x128xf32>, vector<128x128xf32>, vector<1x128xf32> -> vector<1x128xf32>
        %22 = arith.addf %17, %21 : vector<1x128xf32>
        %c0_14 = arith.constant 0 : index
        %c0_15 = arith.constant 0 : index
        %c0_16 = arith.constant 0 : index
        %23 = vector.load %arg5[%c0_14, %c0_15, %c0_16] : memref<1x1x128xf32, #tpu.memory_space<vmem>>, vector<1x1x128xf32>
        %24 = vector.shape_cast %23 : vector<1x1x128xf32> to vector<1x128xf32>
        %25 = vector.shape_cast %22 : vector<1x128xf32> to vector<1x1x128xf32>
        tpu.vector_store %arg5[%c0_14, %c0_15, %c0_16], %25 {strides = array<i32>} : memref<1x1x128xf32, #tpu.memory_space<vmem>>, vector<1x1x128xf32>,
      } else {
      }
    }
    %c2_i32_4 = arith.constant 2 : i32
    return
  }
  func.func @transform_0(%arg0: i32, %arg1: i32, %arg2: i32) -> (i32, i32, i32) {
    %c0_i32 = arith.constant 0 : i32
    %c0_i32_0 = arith.constant 0 : i32
    %c0_i32_1 = arith.constant 0 : i32
    return %arg0, %c0_i32, %c0_i32_0 : i32, i32, i32
  }
  func.func @transform_1(%arg0: i32, %arg1: i32, %arg2: i32) -> (i32, i32, i32) {
    %c0_i32 = arith.constant 0 : i32
    %c0_i32_0 = arith.constant 0 : i32
    %c0_i32_1 = arith.constant 0 : i32
    return %arg2, %c0_i32, %c0_i32_0 : i32, i32, i32
  }
  func.func @transform_2(%arg0: i32, %arg1: i32, %arg2: i32) -> (i32, i32, i32) {
    %c0_i32 = arith.constant 0 : i32
    %c0_i32_0 = arith.constant 0 : i32
    return %arg0, %arg1, %c0_i32 : i32, i32, i32
  }
}

</mosaic_0001>

<bundles_post_ra>
// kernel: tpu_custom_call.1
= control target key start
LH: loop header
LB: loop body
LE: loop exit
PB: predicated region body
PF: predicated region fallthrough
CT: control target
= control target key end

     0   :  { %7 = vsyncpa [#allocation3], 0  ;;  %s965_s0 = inlined_call_operand.hbm [shape: f32[2,2,128], index: 0, kind: input, shape index: {}]   ;;  %s966_s1 = inlined_call_operand.hbm [shape: f32[2,128,128], index: 1, kind: input, shape index: {}]   ;;  %s967_s2 = inlined_call_operand.hbm [shape: f32[2,1,128], index: 2, kind: output, shape index: {}]  }
   0x1   :  { %9 = vsyncpa [#allocation3 + $0x1], 0 }
   0x2   :  { %10 = vsyncpa [#allocation6], 0 }
   0x3   :  { %11 = vsyncpa [#allocation4], 0 }
   0x4   :  { %13 = vsyncpa [#allocation4 + $0x1], 0  ;;  %s755_s9 = smov 0   ;;  %s757_s10 = smov 0  }
   0x5   :  { %s759_s11 = smov 0   ;;  %s761_s12 = smov 0  }
   0x6   :  { %s763_s13 = smov 0   ;;  %s765_s14 = smov 0  }
   0x7 LB: > { %s431_s15 = sadd.s32 4294967295, %s726_s14   ;;  %s432_s16 = sadd.s32 4294967294, %s726_s14   ;;  %s726_s14 = sphi %s765_s14, %s19_s14   ;;  %s722_s13 = sphi %s763_s13, %s986_s13   ;;  %s718_s12 = sphi %s761_s12, %s985_s12   ;;  %s714_s11 = sphi %s759_s11, %s984_s11   ;;  %s710_s10 = sphi %s757_s10, %s983_s10   ;;  %s706_s9 = sphi %s755_s9, %s982_s9  }
   0x8   : > { %p58_p0 = scmp.ne.s32.totalorder %s710_s10, %s706_s9  ;;  %p789_p1 = scmp.eq.s32.totalorder %s431_s15, 0 }
   0x9   : > { %p793_p2 = scmp.eq.s32.totalorder %s431_s15, 1  ;;  %p116_p3 = scmp.eq.s32.totalorder %s432_s16, 1 }
   0xa   : > { %p799_p4 = por %p789_p1, %p58_p0  ;;  %p433_p5 = scmp.ge.s32.totalorder %s726_s14, 1 }
   0xb   : > { %p804_p6 = por %p116_p3, %p58_p0  ;;  %p123_p7 = scmp.lt.s32.totalorder %s726_s14, 3 }
   0xc   : > { %s971_s19 = scalar_select %p799_p4, 1, 0 }
   0xd   : > { %s972_s20 = scalar_select %p804_p6, 1, 0 }
   0xe   : > { %p809_p8 = pnand %p433_p5, %p123_p7  ;;  %s732_s22 = smov [#allocation5]  }
   0xf   : > { %s139_s23 = sshll.u32 %s732_s22, 4  ;;  %s38_s25 = sadd.s32 1, %s722_s13  ;;  %s140_s23 = int_to_ptr.vmem [resolvable:$true] %s139_s23 }
  0x10   : > { %p506_p9 = pneg %p809_p8  ;;  %s595_s26 = scalar_lea.vmem %s140_s23, 4096 }
  0x11   : > { %p596_p13 = scmp.ne.s32.totalorder %s140_s23, %s595_s26  ;;  %p603_p5 = scmp.lt.s32.totalorder %s140_s23, %s140_s23 }
  0x12   : > { %p818_p11 = pnand %p506_p9, %p789_p1  ;;  %p604_p7 = scmp.lt.s32.totalorder %s595_s26, %s595_s26 }
  0x14   : > { %p586_p12 = pneg %p818_p11  ;;  %p605_p6 = por %p604_p7, %p603_p5 }
  0x16   : > { %p598_p0 = pnand %p596_p13, %p586_p12 }
  0x18   : > { %p599_p3 = pneg %p598_p0 }
  0x1a   : > { %p606_p4 = pnand %p605_p6, %p599_p3 }
  0x1c   : > { %609 = shalt.err (!%p606_p4)
}
  0x1d   : > { %s733_s27 = smov 128   ;;  %s734_s28 = smov 8  }
  0x1e   : > { %509 = dma.hbm_to_vmem [thread:$0]  (!%p818_p11), %s966_s1, 4096, %s140_s23, [#allocation6], %s733_s27, %s733_s27, %s734_s28  }
  0x1f   : > { %p40_p6 = scmp.ge.s32.totalorder %s38_s25, 2  ;;  %s45_s3 = sadd.s32 1, %s714_s11 }
  0x20   : > { %p52_p4 = scmp.ne.s32.totalorder %s714_s11, %s710_s10  ;;  %p53_p9 = scmp.eq.s32.totalorder %s726_s14, 0 }
  0x21   : > { %s988_s25 = smov (%p40_p6, %s38_s25), 0  ;;  %p519_p0 = scmp.lt.s32.totalorder %s726_s14, 2 }
  0x22   : > { %p836_p12 = por %p53_p9, %p52_p4  ;;  %p842_p13 = por %p793_p2, %p52_p4 }
  0x23   : > { %s42_s6 = ssub.s32 %s722_s13, %s988_s25  ;;  %s153_s7 = sand.u32 1, %s714_s11  }
  0x24   : > { %p43_p11 = scmp.eq.s32.totalorder %s42_s6, 0  ;;  %s436_s8 = sshll.u32 %s153_s7, 1 }
  0x25   : > { %s437_s16 = sshll.u32 %s722_s13, 5  ;;  %s157_s26 = scalar_lea.vmem [#allocation2], %s436_s8 }
  0x26   : > { %s851_s15 = scalar_select %p43_p11, %s714_s11, %s45_s3  }
  0x27   : > { %s162_s24 = scalar_lea.hbm %s965_s0, %s437_s16  ;;  %s164_s27 = sshll.u32 %s157_s26, 4  ;;  %s165_s27 = int_to_ptr.vmem [resolvable:$true] %s164_s27 }
  0x28   : > { %p859_p2 = pnand %p519_p0, %p836_p12  ;;  %s154_s28 = scalar_lea.sflag [#allocation3], %s153_s7 }
  0x29   : > { %s623_s29 = scalar_lea.vmem %s165_s27, 32  ;;  %s735_s30 = smov [#allocation2]  }
  0x2a   : > { %p612_p3 = pneg %p859_p2  ;;  %p624_p5 = scmp.ne.s32.totalorder %s165_s27, %s623_s29 }
  0x2b   : > { %s628_s3 = sshll.u32 %s735_s30, 4  ;;  %s629_s3 = int_to_ptr.vmem [resolvable:$false] %s628_s3 }
  0x2c   : > { %p626_p7 = pnand %p624_p5, %p612_p3  ;;  %s630_s6 = scalar_lea.vmem %s629_s3, 64 }
  0x2d   : > { %p631_p4 = scmp.lt.s32.totalorder %s165_s27, %s629_s3  ;;  %p632_p9 = scmp.lt.s32.totalorder %s630_s6, %s623_s29 }
  0x2e   : > { %p627_p6 = pneg %p626_p7 }
  0x2f   : > { %p633_p11 = por %p632_p9, %p631_p4 }
  0x31   : > { %p634_p10 = pnand %p633_p11, %p627_p6 }
  0x33   : > { %637 = shalt.err (!%p634_p10)
}
  0x34   : > { %513 = dma.hbm_to_vmem [thread:$0]  (!%p859_p2), %s162_s24, 32, %s165_s27, %s154_s28  }
  0x35   : > { %173 = sbr.rel (%p809_p8) target bundleno = 325 (0x145), region = 28  ;;  %s870_s4 = sand.u32 (!%p809_p8), 1, %s710_s10  }
  0x36   : > { %s439_s7 = sshll.u32 (!%p809_p8), %s870_s4, 1  ;;  %s176_s8 = scalar_lea.sflag (!%p809_p8), [#allocation3], %s870_s4 }
  0x37   : > { %s874_s16 = scalar_lea.vmem (!%p809_p8), [#allocation2], %s439_s7  ;;  %p978_p12 = scmp.ne.s32.totalorder (!%p809_p8), %s971_s19, 0 }
  0x3a   : > { %693 = dma.done.wait (%p978_p12), %s176_s8, 32  }
  0x3b   : > { %695 = vsyncadd (%p978_p12), %s176_s8, 4294967264 }
  0x3c   : > { %697 = dma.done.wait (%p789_p1), [#allocation6], 4096  }
  0x3d   : > { %699 = vsyncadd (%p789_p1), [#allocation6], 4294963200  ;;  %s885_s21 = scalar_lea.vmem [#allocation7], %s870_s4  ;;  %v736_v0 = vmov 0.0   ;;  %s888_s22 = smov 0  }
  0x3e   : > { %208 = vst [vmem:[%s885_s21] sm:$0x1] %v736_v0 }
  0x3f LB: >> { %s894_s19 = sadd.s32 1, %s730_s22   ;;  %s730_s22 = sphi %s888_s22, %s979_s22  }
  0x40   : >> { %p441_p8 = scmp.le.s32.totalorder %s894_s19, 0 }
  0x41   : >> { %s442_s17 = sshll.u32 (!%p441_p8), %s730_s22, 7  ;;  %s223_s24 = scalar_lea.vmem (!%p441_p8), %s874_s16, %s730_s22 [#allocation2] }
  0x42   : >> { %222 = sbr.rel (%p441_p8) target bundleno = 300 (0x12c), region = 51  ;;  %s898_s23 = scalar_lea.vmem (!%p441_p8), [#allocation5], %s442_s17 }
  0x47   : >> { %v737_v1 = vmov 0.0   ;;  %vm738_vm0 = vmmov 0   ;;  %v243_v2 = vld [vmem:[%s898_s23 + $0x78] sm:$0xff]  ;;  %v242_v3 = vld [vmem:[%s898_s23 + $0x70] sm:$0xff]  ;;  %v241_v4 = vld [vmem:[%s898_s23 + $0x68] sm:$0xff] }
  0x48   : >> { %463 = vmatprep.subr.mxu0 %v737_v1  ;;  %495 = vmatprep.mubr.msk.f32.mxu0 %vm738_vm0, %v737_v1  ;;  %v240_v5 = vld [vmem:[%s898_s23 + $0x60] sm:$0xff]  ;;  %v239_v6 = vld [vmem:[%s898_s23 + $0x58] sm:$0xff]  ;;  %v238_v7 = vld [vmem:[%s898_s23 + $0x50] sm:$0xff] }
  0x49   : >> { %464 = vmatpush3.msra.mxu0 %v243_v2  ;;  %v237_v8 = vld [vmem:[%s898_s23 + $0x48] sm:$0xff]  ;;  %v236_v9 = vld [vmem:[%s898_s23 + $0x40] sm:$0xff]  ;;  %v235_v10 = vld [vmem:[%s898_s23 + $0x38] sm:$0xff] }
  0x4a   : >> { %465 = vmatprep.subr.mxu0 %v737_v1  ;;  %v234_v11 = vld [vmem:[%s898_s23 + $0x30] sm:$0xff]  ;;  %v233_v12 = vld [vmem:[%s898_s23 + $0x28] sm:$0xff]  ;;  %v232_v13 = vld [vmem:[%s898_s23 + $0x20] sm:$0xff] }
  0x4b   : >> { %466 = vmatpush3.msra.mxu0 %v242_v3  ;;  %v231_v14 = vld [vmem:[%s898_s23 + $0x18] sm:$0xff]  ;;  %v230_v15 = vld [vmem:[%s898_s23 + $0x10] sm:$0xff]  ;;  %v229_v16 = vld [vmem:[%s898_s23 + $0x8] sm:$0xff] }
  0x4c   : >> { %467 = vmatprep.subr.mxu0 %v737_v1  ;;  %v228_v17 = vld [vmem:[%s898_s23] sm:$0xff] }
  0x4d   : >> { %468 = vmatpush3.msra.mxu0 %v241_v4  ;;  %v224_v18 = vld [vmem:[%s223_s24] sm:$0x1] }
  0x4e   : >> { %469 = vmatprep.subr.mxu0 %v737_v1  ;;  %v225_v19 = vld [vmem:[%s885_s21] sm:$0x1] }
  0x4f   : >> { %470 = vmatpush3.msra.mxu0 %v240_v5 }
  0x50   : >> { %471 = vmatprep.subr.mxu0 %v737_v1 }
  0x51   : >> { %472 = vmatpush3.msra.mxu0 %v239_v6 }
  0x52   : >> { %473 = vmatprep.subr.mxu0 %v737_v1 }
  0x53   : >> { %474 = vmatpush3.msra.mxu0 %v238_v7 }
  0x54   : >> { %475 = vmatprep.subr.mxu0 %v737_v1 }
  0x55   : >> { %476 = vmatpush3.msra.mxu0 %v237_v8 }
  0x56   : >> { %477 = vmatprep.subr.mxu0 %v737_v1 }
  0x57   : >> { %478 = vmatpush3.msra.mxu0 %v236_v9 }
  0x58   : >> { %479 = vmatprep.subr.mxu0 %v737_v1 }
  0x59   : >> { %480 = vmatpush3.msra.mxu0 %v235_v10 }
  0x5a   : >> { %481 = vmatprep.subr.mxu0 %v737_v1 }
  0x5b   : >> { %482 = vmatpush3.msra.mxu0 %v234_v11 }
  0x5c   : >> { %483 = vmatprep.subr.mxu0 %v737_v1 }
  0x5d   : >> { %484 = vmatpush3.msra.mxu0 %v233_v12 }
  0x5e   : >> { %485 = vmatprep.subr.mxu0 %v737_v1 }
  0x5f   : >> { %486 = vmatpush3.msra.mxu0 %v232_v13 }
  0x60   : >> { %487 = vmatprep.subr.mxu0 %v737_v1 }
  0x61   : >> { %488 = vmatpush3.msra.mxu0 %v231_v14 }
  0x62   : >> { %489 = vmatprep.subr.mxu0 %v737_v1 }
  0x63   : >> { %490 = vmatpush3.msra.mxu0 %v230_v15 }
  0x64   : >> { %491 = vmatprep.subr.mxu0 %v737_v1 }
  0x65   : >> { %492 = vmatpush3.msra.mxu0 %v229_v16 }
  0x66   : >> { %493 = vmatprep.subr.mxu0 %v737_v1 }
  0x67   : >> { %494 = vmatpush3.msra.mxu0 %v228_v17 }
  0x68   : >> { %496 = vmatmul.mubr.f32.vlgmr.msra.gmra.mxu0 %v224_v18 }
 0x128   : >> { %v310_v20 = vpop.f32.mrf.mxu0 }
 0x129   : >> { %v314_v21 = vadd.f32 %v310_v20, %v225_v19 }
 0x12a   : >> { %v497_v22 = vpop.f32.mrf.mxu0 }
 0x12b   : >> { %315 = vst [vmem:[%s885_s21] sm:$0x1] %v314_v21 }
 0x12c PF: >> { %p212_p1 = scmp.ge.s32.totalorder %s894_s19, 2   ;;  %s979_s22 = smov %s894_s19 }
 0x12d   : > { %s443_s26 = sshll.u32 (%p212_p1), %s718_s12, 4  ;;  %s330_s29 = sshll.u32 (%p212_p1), %s885_s21, 4  ;;  %s331_s29 = int_to_ptr.vmem [resolvable:$true] %s330_s29 }
 0x12e   : > { %214 = sbr.rel (!%p212_p1) target bundleno = 63 (0x3f), region = 95  ;;  %s328_s28 = scalar_lea.hbm (%p212_p1), %s967_s2, %s443_s26 }
 0x12f   : > { %s317_s30 = scalar_lea.sflag (%p212_p1), [#allocation4], %s870_s4  ;;  %s638_s3 = scalar_lea.vmem (%p212_p1), %s331_s29, 16 }
 0x130   : > { %p639_p10 = scmp.ne.s32.totalorder (%p212_p1), %s331_s29, %s638_s3  ;;  %s739_s6 = smov (%p212_p1), [#allocation7]  }
 0x131   : > { %s642_s7 = sshll.u32 (%p212_p1), %s739_s6, 4  ;;  %s643_s7 = int_to_ptr.vmem [resolvable:$false] %s642_s7 }
 0x132   : > { %p640_p0 = pnand (%p212_p1), %p639_p10, %p842_p13  ;;  %s644_s8 = scalar_lea.vmem (%p212_p1), %s643_s7, 32 }
 0x133   : > { %p645_p3 = scmp.lt.s32.totalorder %s331_s29, %s643_s7  ;;  %p646_p5 = scmp.lt.s32.totalorder %s644_s8, %s638_s3 }
 0x134   : > { %p641_p2 = pneg %p640_p0 }
 0x135   : > { %p647_p7 = por %p646_p5, %p645_p3 }
 0x137   : > { %p648_p6 = pnand %p647_p7, %p641_p2 }
 0x139   : > { %651 = shalt.err (!%p648_p6)
}
 0x13a   : > { %s652_s12 = scalar_lea.hbm %s328_s28, 16  ;;  %s656_s21 = scalar_lea.hbm %s967_s2, 32 }
 0x13b   : > { %p653_p4 = scmp.ne.s32.totalorder %s328_s28, %s652_s12  ;;  %p657_p12 = scmp.lt.s32.totalorder %s328_s28, %s967_s2 }
 0x13c   : > { %p658_p8 = scmp.lt.s32.totalorder %s656_s21, %s652_s12 }
 0x13d   : > { %p654_p9 = pnand %p653_p4, %p842_p13 }
 0x13e   : > { %p659_p1 = por %p658_p8, %p657_p12 }
 0x13f   : > { %p655_p11 = pneg %p654_p9 }
 0x141   : > { %p660_p10 = pnand %p659_p1, %p655_p11 }
 0x143   : > { %663 = shalt.err (!%p660_p10)
}
 0x144   : > { %504 = dma.vmem_to_hbm [thread:$0]  (%p842_p13), %s331_s29, 16, %s328_s28, %s317_s30  }
 0x145 PF: > { %s342_s17 = sand.u32 1, %s706_s9   ;;  %p980_p0 = scmp.ne.s32.totalorder %s972_s20, 0 }
 0x146   : > { %p981_p2 = scmp.ge.s32.totalorder %s726_s14, 2  ;;  %s343_s23 = scalar_lea.sflag [#allocation4], %s342_s17 }
 0x148   : > { %p515_p3 = pnand %p981_p2, %p980_p0 }
 0x14a   : > { %p516_p5 = pneg %p515_p3 }
 0x14c   : > { %701 = dma.done.wait (%p516_p5), %s343_s23, 16  }
 0x14d   : > { %703 = vsyncadd (%p516_p5), %s343_s23, 4294967280  ;;  %s19_s14 = sadd.s32 1, %s726_s14   ;;  %s982_s9 = smov %s710_s10 }
 0x14e   : > { %p16_p7 = scmp.ge.s32.totalorder %s19_s14, 4   ;;  %s983_s10 = smov %s714_s11 }
 0x14f   : > { %s984_s11 = smov %s851_s15  ;;  %s985_s12 = smov %s722_s13 }
 0x150   : > { %s986_s13 = smov %s988_s25  ;;  %18 = sbr.rel (!%p16_p7) target bundleno = 7 (0x7), region = 106 }
 0x155   :  { %347 = vsyncpa [#allocation3], 1 }
 0x156   :  { %349 = vsyncpa [#allocation3 + $0x1], 1 }
 0x157   :  { %350 = vsyncpa [#allocation6], 1 }
 0x158   :  { %351 = vsyncpa [#allocation4], 1 }
 0x159   :  { %353 = vsyncpa [#allocation4 + $0x1], 1 }

</bundles_post_ra>
